<compile_context>
chip_gen: v6e
topology: v6e:2x2x1
jax: 0.10.0
libtpu: 0.0.40
codegen_flags: <defaults>
</compile_context>

<pallas_src>
import jax
import jax.numpy as jnp
from jax import lax
from jax.experimental import pallas as pl
from jax.experimental.pallas import tpu as pltpu

EPS = 1e-5
GUARD = 128  # guard lanes on each side of the guarded (source) buffers


def _round_up(x, m):
    return (x + m - 1) // m * m


def _make_fused_kernel(n, c, h, w):
    """Build the fused BasicBlock kernel for fixed (N, C, H, W).

    Layout: every stage array is [channels(padded to 8), lanes], where
    lane l = GUARD + f (guarded source buffers) or l = f (compute buffers) and
    f = ((img * Hp) + y) * Wp + x indexes the zero-padded spatial grid.
    """
    hp, wp = h + 2, w + 2                  # padded spatial dims (padding = 1)
    mp = n * hp * wp                       # flattened padded spatial size
    cw = _round_up(mp, 128)                # compute width (lane-dense)
    sw = cw + 2 * GUARD                    # source width (with slide guards)
    cp = _round_up(c, 8)                   # channels padded to full sublanes
    kk = 9 * cp                            # packed contraction (taps x chans)
    m_valid = n * h * w                    # number of real output pixels
    inv_cnt = 1.0 / float(m_valid)
    # tap t = ky*3 + kx  ->  flat lane shift in padded coords (|s| <= wp+1)
    tap_shifts = [(ky - 1) * wp + (kx - 1) for ky in range(3) for kx in range(3)]

    def build_stack(src_ref, stk_ref):
        # Pack the 9 tap windows along the contraction dim.  Each window is
        # read directly from the guarded VMEM Ref; interior outputs never
        # read outside the guard bands and never cross image boundaries.
        for t, s in enumerate(tap_shifts):
            stk_ref[t * cp:(t + 1) * cp, :] = src_ref[:, GUARD + s:GUARD + s + cw]

    def bn_fold(y, mask, g, b):
        # BatchNorm2d (training mode), single-pass masked stats over the
        # m_valid real pixels (biased var, clamped >= 0), folded into one
        # per-channel scale/shift.  Accumulation is f32; fine at this scale.
        ym = y * mask                                            # [cp, cw]
        mean = jnp.sum(ym, axis=1, keepdims=True) * inv_cnt      # [cp, 1]
        var = jnp.maximum(
            jnp.sum(ym * y, axis=1, keepdims=True) * inv_cnt - mean * mean, 0.0)
        scale = g * lax.rsqrt(var + EPS)
        shift = b - mean * scale
        return scale, shift

    def kernel(xfw_ref, mask_ref, w1_ref, w2_ref,
               g1_ref, b1_ref, g2_ref, b2_ref, o_ref, stk_ref, a1g_ref):
        mask = mask_ref[...]                                     # [1, cw]

        # ---- conv1 (one K=72 MXU dot, bf16 operands) -> bn1 -> relu ----
        build_stack(xfw_ref, stk_ref)
        y1 = jnp.dot(w1_ref[...], stk_ref[...].astype(jnp.bfloat16),
                     preferred_element_type=jnp.float32)         # [cp, cw]
        s1, t1 = bn_fold(y1, mask, g1_ref[...], b1_ref[...])
        a1 = jnp.maximum(y1 * s1 + t1, 0.0) * mask               # masked relu

        # ---- stage a1 in VMEM scratch; zero only the guard bands ----
        a1g_ref[:, :GUARD] = jnp.zeros((cp, GUARD), jnp.float32)
        a1g_ref[:, GUARD + cw:sw] = jnp.zeros((cp, GUARD), jnp.float32)
        a1g_ref[:, GUARD:GUARD + cw] = a1

        # ---- conv2 (one K=72 MXU dot) -> bn2 -> +identity -> relu ----
        build_stack(a1g_ref, stk_ref)
        y2 = jnp.dot(w2_ref[...], stk_ref[...].astype(jnp.bfloat16),
                     preferred_element_type=jnp.float32)
        s2, t2 = bn_fold(y2, mask, g2_ref[...], b2_ref[...])
        identity = xfw_ref[:, GUARD:GUARD + cw]                  # aligned slice
        o_ref[...] = jnp.maximum(y2 * s2 + t2 + identity, 0.0)

    consts = dict(hp=hp, wp=wp, mp=mp, cw=cw, sw=sw, cp=cp, kk=kk)
    return kernel, consts


def basic_block_forward(x_nchw, params):
    """relu(bn2(conv2(relu(bn1(conv1(x))))) + x), 3x3 convs, pad=1, stride=1."""
    n, c, h, w = x_nchw.shape
    p = params["w1"].shape[0]
    if p != c:
        raise ValueError("downsample=None requires inplanes == planes")
    kernel_fn, k = _make_fused_kernel(n, c, h, w)
    hp, wp, mp, cw, sw, cp, kk = (k["hp"], k["wp"], k["mp"], k["cw"], k["sw"],
                                  k["cp"], k["kk"])

    # Channels-on-sublanes / flattened-padded-spatial-on-lanes, guard-banded.
    # TODO(synk): at real sizes stage this layout inside the kernel (no extra
    # HBM passes) instead of wrapper-side pad/transpose/reshape.
    xp = jnp.pad(x_nchw, ((0, 0), (0, 0), (1, 1), (1, 1)))        # [n,c,hp,wp]
    xf = jnp.transpose(xp, (1, 0, 2, 3)).reshape(c, mp)           # [c, mp]
    xfw = jnp.pad(xf, ((0, cp - c), (GUARD, sw - GUARD - mp)))    # [cp, sw]

    # 1.0 at lanes holding real (non-padding) output pixels.
    mask = jnp.pad(jnp.ones((n, h, w), jnp.float32),
                   ((0, 0), (1, 1), (1, 1))).reshape(1, mp)
    mask = jnp.pad(mask, ((0, 0), (0, cw - mp)))                  # [1, cw]

    def prep_w(w_oihw):  # [O, I, 3, 3] -> [cp, 9*cp] bf16, tap-major columns
        o_, i_, kh_, kw_ = w_oihw.shape
        wt = jnp.transpose(w_oihw, (0, 2, 3, 1)).reshape(o_, kh_ * kw_, i_)
        wt = jnp.pad(wt, ((0, cp - o_), (0, 0), (0, cp - i_)))    # [cp, 9, cp]
        return wt.reshape(cp, kk).astype(jnp.bfloat16)

    def prep_v(v):       # [C] -> [cp, 1] (zero padded)
        return jnp.pad(v.reshape(-1, 1), ((0, cp - v.shape[0]), (0, 0)))

    w1, w2 = prep_w(params["w1"]), prep_w(params["w2"])
    g1, b1 = prep_v(params["g1"]), prep_v(params["b1"])
    g2, b2 = prep_v(params["g2"]), prep_v(params["b2"])

    vmem = pl.BlockSpec(memory_space=pltpu.MemorySpace.VMEM)
    out = pl.pallas_call(
        kernel_fn,
        out_shape=jax.ShapeDtypeStruct((cp, cw), jnp.float32),
        in_specs=[vmem] * 8,
        out_specs=vmem,
        scratch_shapes=[pltpu.VMEM((kk, cw), jnp.float32),   # packed conv operand
                        pltpu.VMEM((cp, sw), jnp.float32)],  # guarded a1 staging
    )(xfw, mask, w1, w2, g1, b1, g2, b2)

    out = out[:c, :mp].reshape(c, n, hp, wp)[:, :, 1:h + 1, 1:w + 1]
    return jnp.transpose(out, (1, 0, 2, 3))                       # back to NCHW


def _reference_forward(x, params):
    """Pure-JAX NCHW reference (f32 everywhere) for a correctness check."""
    def bn_train(y, g, b):
        mean = jnp.mean(y, axis=(0, 2, 3), keepdims=True)
        var = jnp.mean(jnp.square(y - mean), axis=(0, 2, 3), keepdims=True)
        return g[None, :, None, None] * (y - mean) * lax.rsqrt(var + EPS) \
            + b[None, :, None, None]

    dn = ("NCHW", "OIHW", "NCHW")
    out = lax.conv_general_dilated(x, params["w1"], (1, 1),
                                   ((1, 1), (1, 1)), dimension_numbers=dn)
    out = jnp.maximum(bn_train(out, params["g1"], params["b1"]), 0.0)
    out = lax.conv_general_dilated(out, params["w2"], (1, 1),
                                   ((1, 1), (1, 1)), dimension_numbers=dn)
    out = bn_train(out, params["g2"], params["b2"]) + x
    return jnp.maximum(out, 0.0)


if __name__ == "__main__":
    key = jax.random.PRNGKey(0)
    k_x, k_w1, k_w2 = jax.random.split(key, 3)

    N, C, H, W = 2, 4, 16, 16          # inplanes = planes = 4
    kh, kw = 3, 3

    x = jax.random.normal(k_x, (N, C, H, W), jnp.float32)

    params = {
        "w1": 0.1 * jax.random.normal(k_w1, (C, C, kh, kw), jnp.float32),
        "w2": 0.1 * jax.random.normal(k_w2, (C, C, kh, kw), jnp.float32),
        "g1": jnp.ones((C,), jnp.float32),   # BatchNorm2d default weight
        "b1": jnp.zeros((C,), jnp.float32),  # BatchNorm2d default bias
        "g2": jnp.ones((C,), jnp.float32),
        "b2": jnp.zeros((C,), jnp.float32),
    }

    fwd = jax.jit(basic_block_forward)
    out = jax.block_until_ready(fwd(x, params))
    ref = jax.block_until_ready(_reference_forward(x, params))

    assert out.shape == (N, C, H, W)
    # Tolerance covers bf16 MXU operands (f32 accumulation, f32 BN stats).
    assert jnp.allclose(out, ref, rtol=2e-2, atol=2e-2)
    print("KERNEL_OK")
</pallas_src>

<mosaic_0001>
module attributes {stable_mosaic.version = 11 : i64} {
  func.func @kernel(%arg0: memref<8x1024xf32, #tpu.memory_space<vmem>>, %arg1: memref<1x768xf32, #tpu.memory_space<vmem>>, %arg2: memref<8x72xbf16, #tpu.memory_space<vmem>>, %arg3: memref<8x72xbf16, #tpu.memory_space<vmem>>, %arg4: memref<8x1xf32, #tpu.memory_space<vmem>>, %arg5: memref<8x1xf32, #tpu.memory_space<vmem>>, %arg6: memref<8x1xf32, #tpu.memory_space<vmem>>, %arg7: memref<8x1xf32, #tpu.memory_space<vmem>>, %arg8: memref<8x768xf32, #tpu.memory_space<vmem>>, %arg9: memref<72x768xf32, #tpu.memory_space<vmem>>, %arg10: memref<8x1024xf32, #tpu.memory_space<vmem>>) attributes {dimension_semantics = [], scalar_prefetch = 0 : i64, scratch_operands = 2 : i64, tpu.core_type = #tpu.core_type<tc>} {
    %c0 = arith.constant 0 : index
    %c0_0 = arith.constant 0 : index
    %0 = vector.load %arg1[%c0, %c0_0] : memref<1x768xf32, #tpu.memory_space<vmem>>, vector<1x768xf32>
    %c0_1 = arith.constant 0 : index
    %c109 = arith.constant 109 : index
    %1 = vector.load %arg0[%c0_1, %c109] : memref<8x1024xf32, #tpu.memory_space<vmem>>, vector<8x768xf32>
    %c0_2 = arith.constant 0 : index
    %c0_3 = arith.constant 0 : index
    %2 = vector.load %arg9[%c0_2, %c0_3] : memref<72x768xf32, #tpu.memory_space<vmem>>, vector<8x768xf32>
    tpu.vector_store %arg9[%c0_2, %c0_3], %1 {strides = array<i32>} : memref<72x768xf32, #tpu.memory_space<vmem>>, vector<8x768xf32>,
    %c0_4 = arith.constant 0 : index
    %c110 = arith.constant 110 : index
    %3 = vector.load %arg0[%c0_4, %c110] : memref<8x1024xf32, #tpu.memory_space<vmem>>, vector<8x768xf32>
    %c8 = arith.constant 8 : index
    %c0_5 = arith.constant 0 : index
    %4 = vector.load %arg9[%c8, %c0_5] : memref<72x768xf32, #tpu.memory_space<vmem>>, vector<8x768xf32>
    tpu.vector_store %arg9[%c8, %c0_5], %3 {strides = array<i32>} : memref<72x768xf32, #tpu.memory_space<vmem>>, vector<8x768xf32>,
    %c0_6 = arith.constant 0 : index
    %c111 = arith.constant 111 : index
    %5 = vector.load %arg0[%c0_6, %c111] : memref<8x1024xf32, #tpu.memory_space<vmem>>, vector<8x768xf32>
    %c16 = arith.constant 16 : index
    %c0_7 = arith.constant 0 : index
    %6 = vector.load %arg9[%c16, %c0_7] : memref<72x768xf32, #tpu.memory_space<vmem>>, vector<8x768xf32>
    tpu.vector_store %arg9[%c16, %c0_7], %5 {strides = array<i32>} : memref<72x768xf32, #tpu.memory_space<vmem>>, vector<8x768xf32>,
    %c0_8 = arith.constant 0 : index
    %c127 = arith.constant 127 : index
    %7 = vector.load %arg0[%c0_8, %c127] : memref<8x1024xf32, #tpu.memory_space<vmem>>, vector<8x768xf32>
    %c24 = arith.constant 24 : index
    %c0_9 = arith.constant 0 : index
    %8 = vector.load %arg9[%c24, %c0_9] : memref<72x768xf32, #tpu.memory_space<vmem>>, vector<8x768xf32>
    tpu.vector_store %arg9[%c24, %c0_9], %7 {strides = array<i32>} : memref<72x768xf32, #tpu.memory_space<vmem>>, vector<8x768xf32>,
    %c0_10 = arith.constant 0 : index
    %c128 = arith.constant 128 : index
    %9 = vector.load %arg0[%c0_10, %c128] : memref<8x1024xf32, #tpu.memory_space<vmem>>, vector<8x768xf32>
    %c32 = arith.constant 32 : index
    %c0_11 = arith.constant 0 : index
    %10 = vector.load %arg9[%c32, %c0_11] : memref<72x768xf32, #tpu.memory_space<vmem>>, vector<8x768xf32>
    tpu.vector_store %arg9[%c32, %c0_11], %9 {strides = array<i32>} : memref<72x768xf32, #tpu.memory_space<vmem>>, vector<8x768xf32>,
    %c0_12 = arith.constant 0 : index
    %c129 = arith.constant 129 : index
    %11 = vector.load %arg0[%c0_12, %c129] : memref<8x1024xf32, #tpu.memory_space<vmem>>, vector<8x768xf32>
    %c40 = arith.constant 40 : index
    %c0_13 = arith.constant 0 : index
    %12 = vector.load %arg9[%c40, %c0_13] : memref<72x768xf32, #tpu.memory_space<vmem>>, vector<8x768xf32>
    tpu.vector_store %arg9[%c40, %c0_13], %11 {strides = array<i32>} : memref<72x768xf32, #tpu.memory_space<vmem>>, vector<8x768xf32>,
    %c0_14 = arith.constant 0 : index
    %c145 = arith.constant 145 : index
    %13 = vector.load %arg0[%c0_14, %c145] : memref<8x1024xf32, #tpu.memory_space<vmem>>, vector<8x768xf32>
    %c48 = arith.constant 48 : index
    %c0_15 = arith.constant 0 : index
    %14 = vector.load %arg9[%c48, %c0_15] : memref<72x768xf32, #tpu.memory_space<vmem>>, vector<8x768xf32>
    tpu.vector_store %arg9[%c48, %c0_15], %13 {strides = array<i32>} : memref<72x768xf32, #tpu.memory_space<vmem>>, vector<8x768xf32>,
    %c0_16 = arith.constant 0 : index
    %c146 = arith.constant 146 : index
    %15 = vector.load %arg0[%c0_16, %c146] : memref<8x1024xf32, #tpu.memory_space<vmem>>, vector<8x768xf32>
    %c56 = arith.constant 56 : index
    %c0_17 = arith.constant 0 : index
    %16 = vector.load %arg9[%c56, %c0_17] : memref<72x768xf32, #tpu.memory_space<vmem>>, vector<8x768xf32>
    tpu.vector_store %arg9[%c56, %c0_17], %15 {strides = array<i32>} : memref<72x768xf32, #tpu.memory_space<vmem>>, vector<8x768xf32>,
    %c0_18 = arith.constant 0 : index
    %c147 = arith.constant 147 : index
    %17 = vector.load %arg0[%c0_18, %c147] : memref<8x1024xf32, #tpu.memory_space<vmem>>, vector<8x768xf32>
    %c64 = arith.constant 64 : index
    %c0_19 = arith.constant 0 : index
    %18 = vector.load %arg9[%c64, %c0_19] : memref<72x768xf32, #tpu.memory_space<vmem>>, vector<8x768xf32>
    tpu.vector_store %arg9[%c64, %c0_19], %17 {strides = array<i32>} : memref<72x768xf32, #tpu.memory_space<vmem>>, vector<8x768xf32>,
    %c0_20 = arith.constant 0 : index
    %c0_21 = arith.constant 0 : index
    %19 = vector.load %arg2[%c0_20, %c0_21] : memref<8x72xbf16, #tpu.memory_space<vmem>>, vector<8x72xbf16>
    %c0_22 = arith.constant 0 : index
    %c0_23 = arith.constant 0 : index
    %20 = vector.load %arg9[%c0_22, %c0_23] : memref<72x768xf32, #tpu.memory_space<vmem>>, vector<72x768xf32>
    %21 = arith.truncf %20 : vector<72x768xf32> to vector<72x768xbf16>
    %cst = arith.constant dense<0.000000e+00> : vector<8x768xf32>
    %22 = tpu.matmul %19, %21, %cst {dimension_numbers = #tpu.dot_dimension_numbers<[1], [0], [0], [1], [0, 0, 1, 1], [], []>} : vector<8x72xbf16>, vector<72x768xbf16>, vector<8x768xf32> -> vector<8x768xf32>
    %c0_24 = arith.constant 0 : index
    %c0_25 = arith.constant 0 : index
    %23 = vector.load %arg4[%c0_24, %c0_25] : memref<8x1xf32, #tpu.memory_space<vmem>>, vector<8x1xf32>
    %c0_26 = arith.constant 0 : index
    %c0_27 = arith.constant 0 : index
    %24 = vector.load %arg5[%c0_26, %c0_27] : memref<8x1xf32, #tpu.memory_space<vmem>>, vector<8x1xf32>
    %25 = vector.broadcast %0 : vector<1x768xf32> to vector<8x768xf32>
    %26 = arith.mulf %22, %25 : vector<8x768xf32>
    %cst_28 = arith.constant dense<0.000000e+00> : vector<8xf32>
    %27 = vector.multi_reduction <add>, %26, %cst_28 [1] : vector<8x768xf32> to vector<8xf32>
    %28 = vector.shape_cast %27 : vector<8xf32> to vector<8x1xf32>
    %cst_29 = arith.constant 0.001953125 : f32
    %29 = vector.broadcast %cst_29 : f32 to vector<8x1xf32>
    %30 = arith.mulf %28, %29 : vector<8x1xf32>
    %31 = arith.mulf %26, %22 : vector<8x768xf32>
    %cst_30 = arith.constant dense<0.000000e+00> : vector<8xf32>
    %32 = vector.multi_reduction <add>, %31, %cst_30 [1] : vector<8x768xf32> to vector<8xf32>
    %33 = vector.shape_cast %32 : vector<8xf32> to vector<8x1xf32>
    %cst_31 = arith.constant 0.001953125 : f32
    %34 = vector.broadcast %cst_31 : f32 to vector<8x1xf32>
    %35 = arith.mulf %33, %34 : vector<8x1xf32>
    %36 = arith.mulf %30, %30 : vector<8x1xf32>
    %37 = arith.subf %35, %36 : vector<8x1xf32>
    %cst_32 = arith.constant 0.000000e+00 : f32
    %38 = vector.broadcast %cst_32 : f32 to vector<8x1xf32>
    %39 = arith.maximumf %37, %38 : vector<8x1xf32>
    %cst_33 = arith.constant 9.99999974E-6 : f32
    %40 = vector.broadcast %cst_33 : f32 to vector<8x1xf32>
    %41 = arith.addf %39, %40 : vector<8x1xf32>
    %42 = math.rsqrt %41 : vector<8x1xf32>
    %43 = arith.mulf %23, %42 : vector<8x1xf32>
    %44 = arith.mulf %30, %43 : vector<8x1xf32>
    %45 = arith.subf %24, %44 : vector<8x1xf32>
    %46 = vector.broadcast %43 : vector<8x1xf32> to vector<8x768xf32>
    %47 = arith.mulf %22, %46 : vector<8x768xf32>
    %48 = vector.broadcast %45 : vector<8x1xf32> to vector<8x768xf32>
    %49 = arith.addf %47, %48 : vector<8x768xf32>
    %cst_34 = arith.constant 0.000000e+00 : f32
    %50 = vector.broadcast %cst_34 : f32 to vector<8x768xf32>
    %51 = arith.maximumf %49, %50 : vector<8x768xf32>
    %52 = vector.broadcast %0 : vector<1x768xf32> to vector<8x768xf32>
    %53 = arith.mulf %51, %52 : vector<8x768xf32>
    %cst_35 = arith.constant 0.000000e+00 : f32
    %54 = vector.broadcast %cst_35 : f32 to vector<8x128xf32>
    %c0_36 = arith.constant 0 : index
    %c0_37 = arith.constant 0 : index
    %55 = vector.load %arg10[%c0_36, %c0_37] : memref<8x1024xf32, #tpu.memory_space<vmem>>, vector<8x128xf32>
    tpu.vector_store %arg10[%c0_36, %c0_37], %54 {strides = array<i32>} : memref<8x1024xf32, #tpu.memory_space<vmem>>, vector<8x128xf32>,
    %cst_38 = arith.constant 0.000000e+00 : f32
    %56 = vector.broadcast %cst_38 : f32 to vector<8x128xf32>
    %c0_39 = arith.constant 0 : index
    %c896 = arith.constant 896 : index
    %57 = vector.load %arg10[%c0_39, %c896] : memref<8x1024xf32, #tpu.memory_space<vmem>>, vector<8x128xf32>
    tpu.vector_store %arg10[%c0_39, %c896], %56 {strides = array<i32>} : memref<8x1024xf32, #tpu.memory_space<vmem>>, vector<8x128xf32>,
    %c0_40 = arith.constant 0 : index
    %c128_41 = arith.constant 128 : index
    %58 = vector.load %arg10[%c0_40, %c128_41] : memref<8x1024xf32, #tpu.memory_space<vmem>>, vector<8x768xf32>
    tpu.vector_store %arg10[%c0_40, %c128_41], %53 {strides = array<i32>} : memref<8x1024xf32, #tpu.memory_space<vmem>>, vector<8x768xf32>,
    %c0_42 = arith.constant 0 : index
    %c109_43 = arith.constant 109 : index
    %59 = vector.load %arg10[%c0_42, %c109_43] : memref<8x1024xf32, #tpu.memory_space<vmem>>, vector<8x768xf32>
    %c0_44 = arith.constant 0 : index
    %c0_45 = arith.constant 0 : index
    %60 = vector.load %arg9[%c0_44, %c0_45] : memref<72x768xf32, #tpu.memory_space<vmem>>, vector<8x768xf32>
    tpu.vector_store %arg9[%c0_44, %c0_45], %59 {strides = array<i32>} : memref<72x768xf32, #tpu.memory_space<vmem>>, vector<8x768xf32>,
    %c0_46 = arith.constant 0 : index
    %c110_47 = arith.constant 110 : index
    %61 = vector.load %arg10[%c0_46, %c110_47] : memref<8x1024xf32, #tpu.memory_space<vmem>>, vector<8x768xf32>
    %c8_48 = arith.constant 8 : index
    %c0_49 = arith.constant 0 : index
    %62 = vector.load %arg9[%c8_48, %c0_49] : memref<72x768xf32, #tpu.memory_space<vmem>>, vector<8x768xf32>
    tpu.vector_store %arg9[%c8_48, %c0_49], %61 {strides = array<i32>} : memref<72x768xf32, #tpu.memory_space<vmem>>, vector<8x768xf32>,
    %c0_50 = arith.constant 0 : index
    %c111_51 = arith.constant 111 : index
    %63 = vector.load %arg10[%c0_50, %c111_51] : memref<8x1024xf32, #tpu.memory_space<vmem>>, vector<8x768xf32>
    %c16_52 = arith.constant 16 : index
    %c0_53 = arith.constant 0 : index
    %64 = vector.load %arg9[%c16_52, %c0_53] : memref<72x768xf32, #tpu.memory_space<vmem>>, vector<8x768xf32>
    tpu.vector_store %arg9[%c16_52, %c0_53], %63 {strides = array<i32>} : memref<72x768xf32, #tpu.memory_space<vmem>>, vector<8x768xf32>,
    %c0_54 = arith.constant 0 : index
    %c127_55 = arith.constant 127 : index
    %65 = vector.load %arg10[%c0_54, %c127_55] : memref<8x1024xf32, #tpu.memory_space<vmem>>, vector<8x768xf32>
    %c24_56 = arith.constant 24 : index
    %c0_57 = arith.constant 0 : index
    %66 = vector.load %arg9[%c24_56, %c0_57] : memref<72x768xf32, #tpu.memory_space<vmem>>, vector<8x768xf32>
    tpu.vector_store %arg9[%c24_56, %c0_57], %65 {strides = array<i32>} : memref<72x768xf32, #tpu.memory_space<vmem>>, vector<8x768xf32>,
    %c0_58 = arith.constant 0 : index
    %c128_59 = arith.constant 128 : index
    %67 = vector.load %arg10[%c0_58, %c128_59] : memref<8x1024xf32, #tpu.memory_space<vmem>>, vector<8x768xf32>
    %c32_60 = arith.constant 32 : index
    %c0_61 = arith.constant 0 : index
    %68 = vector.load %arg9[%c32_60, %c0_61] : memref<72x768xf32, #tpu.memory_space<vmem>>, vector<8x768xf32>
    tpu.vector_store %arg9[%c32_60, %c0_61], %67 {strides = array<i32>} : memref<72x768xf32, #tpu.memory_space<vmem>>, vector<8x768xf32>,
    %c0_62 = arith.constant 0 : index
    %c129_63 = arith.constant 129 : index
    %69 = vector.load %arg10[%c0_62, %c129_63] : memref<8x1024xf32, #tpu.memory_space<vmem>>, vector<8x768xf32>
    %c40_64 = arith.constant 40 : index
    %c0_65 = arith.constant 0 : index
    %70 = vector.load %arg9[%c40_64, %c0_65] : memref<72x768xf32, #tpu.memory_space<vmem>>, vector<8x768xf32>
    tpu.vector_store %arg9[%c40_64, %c0_65], %69 {strides = array<i32>} : memref<72x768xf32, #tpu.memory_space<vmem>>, vector<8x768xf32>,
    %c0_66 = arith.constant 0 : index
    %c145_67 = arith.constant 145 : index
    %71 = vector.load %arg10[%c0_66, %c145_67] : memref<8x1024xf32, #tpu.memory_space<vmem>>, vector<8x768xf32>
    %c48_68 = arith.constant 48 : index
    %c0_69 = arith.constant 0 : index
    %72 = vector.load %arg9[%c48_68, %c0_69] : memref<72x768xf32, #tpu.memory_space<vmem>>, vector<8x768xf32>
    tpu.vector_store %arg9[%c48_68, %c0_69], %71 {strides = array<i32>} : memref<72x768xf32, #tpu.memory_space<vmem>>, vector<8x768xf32>,
    %c0_70 = arith.constant 0 : index
    %c146_71 = arith.constant 146 : index
    %73 = vector.load %arg10[%c0_70, %c146_71] : memref<8x1024xf32, #tpu.memory_space<vmem>>, vector<8x768xf32>
    %c56_72 = arith.constant 56 : index
    %c0_73 = arith.constant 0 : index
    %74 = vector.load %arg9[%c56_72, %c0_73] : memref<72x768xf32, #tpu.memory_space<vmem>>, vector<8x768xf32>
    tpu.vector_store %arg9[%c56_72, %c0_73], %73 {strides = array<i32>} : memref<72x768xf32, #tpu.memory_space<vmem>>, vector<8x768xf32>,
    %c0_74 = arith.constant 0 : index
    %c147_75 = arith.constant 147 : index
    %75 = vector.load %arg10[%c0_74, %c147_75] : memref<8x1024xf32, #tpu.memory_space<vmem>>, vector<8x768xf32>
    %c64_76 = arith.constant 64 : index
    %c0_77 = arith.constant 0 : index
    %76 = vector.load %arg9[%c64_76, %c0_77] : memref<72x768xf32, #tpu.memory_space<vmem>>, vector<8x768xf32>
    tpu.vector_store %arg9[%c64_76, %c0_77], %75 {strides = array<i32>} : memref<72x768xf32, #tpu.memory_space<vmem>>, vector<8x768xf32>,
    %c0_78 = arith.constant 0 : index
    %c0_79 = arith.constant 0 : index
    %77 = vector.load %arg3[%c0_78, %c0_79] : memref<8x72xbf16, #tpu.memory_space<vmem>>, vector<8x72xbf16>
    %c0_80 = arith.constant 0 : index
    %c0_81 = arith.constant 0 : index
    %78 = vector.load %arg9[%c0_80, %c0_81] : memref<72x768xf32, #tpu.memory_space<vmem>>, vector<72x768xf32>
    %79 = arith.truncf %78 : vector<72x768xf32> to vector<72x768xbf16>
    %cst_82 = arith.constant dense<0.000000e+00> : vector<8x768xf32>
    %80 = tpu.matmul %77, %79, %cst_82 {dimension_numbers = #tpu.dot_dimension_numbers<[1], [0], [0], [1], [0, 0, 1, 1], [], []>} : vector<8x72xbf16>, vector<72x768xbf16>, vector<8x768xf32> -> vector<8x768xf32>
    %c0_83 = arith.constant 0 : index
    %c0_84 = arith.constant 0 : index
    %81 = vector.load %arg6[%c0_83, %c0_84] : memref<8x1xf32, #tpu.memory_space<vmem>>, vector<8x1xf32>
    %c0_85 = arith.constant 0 : index
    %c0_86 = arith.constant 0 : index
    %82 = vector.load %arg7[%c0_85, %c0_86] : memref<8x1xf32, #tpu.memory_space<vmem>>, vector<8x1xf32>
    %83 = vector.broadcast %0 : vector<1x768xf32> to vector<8x768xf32>
    %84 = arith.mulf %80, %83 : vector<8x768xf32>
    %cst_87 = arith.constant dense<0.000000e+00> : vector<8xf32>
    %85 = vector.multi_reduction <add>, %84, %cst_87 [1] : vector<8x768xf32> to vector<8xf32>
    %86 = vector.shape_cast %85 : vector<8xf32> to vector<8x1xf32>
    %cst_88 = arith.constant 0.001953125 : f32
    %87 = vector.broadcast %cst_88 : f32 to vector<8x1xf32>
    %88 = arith.mulf %86, %87 : vector<8x1xf32>
    %89 = arith.mulf %84, %80 : vector<8x768xf32>
    %cst_89 = arith.constant dense<0.000000e+00> : vector<8xf32>
    %90 = vector.multi_reduction <add>, %89, %cst_89 [1] : vector<8x768xf32> to vector<8xf32>
    %91 = vector.shape_cast %90 : vector<8xf32> to vector<8x1xf32>
    %cst_90 = arith.constant 0.001953125 : f32
    %92 = vector.broadcast %cst_90 : f32 to vector<8x1xf32>
    %93 = arith.mulf %91, %92 : vector<8x1xf32>
    %94 = arith.mulf %88, %88 : vector<8x1xf32>
    %95 = arith.subf %93, %94 : vector<8x1xf32>
    %cst_91 = arith.constant 0.000000e+00 : f32
    %96 = vector.broadcast %cst_91 : f32 to vector<8x1xf32>
    %97 = arith.maximumf %95, %96 : vector<8x1xf32>
    %cst_92 = arith.constant 9.99999974E-6 : f32
    %98 = vector.broadcast %cst_92 : f32 to vector<8x1xf32>
    %99 = arith.addf %97, %98 : vector<8x1xf32>
    %100 = math.rsqrt %99 : vector<8x1xf32>
    %101 = arith.mulf %81, %100 : vector<8x1xf32>
    %102 = arith.mulf %88, %101 : vector<8x1xf32>
    %103 = arith.subf %82, %102 : vector<8x1xf32>
    %c0_93 = arith.constant 0 : index
    %c128_94 = arith.constant 128 : index
    %104 = vector.load %arg0[%c0_93, %c128_94] : memref<8x1024xf32, #tpu.memory_space<vmem>>, vector<8x768xf32>
    %105 = vector.broadcast %101 : vector<8x1xf32> to vector<8x768xf32>
    %106 = arith.mulf %80, %105 : vector<8x768xf32>
    %107 = vector.broadcast %103 : vector<8x1xf32> to vector<8x768xf32>
    %108 = arith.addf %106, %107 : vector<8x768xf32>
    %109 = arith.addf %108, %104 : vector<8x768xf32>
    %cst_95 = arith.constant 0.000000e+00 : f32
    %110 = vector.broadcast %cst_95 : f32 to vector<8x768xf32>
    %111 = arith.maximumf %109, %110 : vector<8x768xf32>
    %c0_96 = arith.constant 0 : index
    %c0_97 = arith.constant 0 : index
    %112 = vector.load %arg8[%c0_96, %c0_97] : memref<8x768xf32, #tpu.memory_space<vmem>>, vector<8x768xf32>
    tpu.vector_store %arg8[%c0_96, %c0_97], %111 {strides = array<i32>} : memref<8x768xf32, #tpu.memory_space<vmem>>, vector<8x768xf32>,
    return
  }
}

</mosaic_0001>

<bundles_post_ra>
// kernel: basic_block_forward.1
= control target key start
LH: loop header
LB: loop body
LE: loop exit
PB: predicated region body
PF: predicated region fallthrough
CT: control target
= control target key end

     0   :  { %s1726_s13 = smov 109   ;;  %s1727_s14 = smov 111   ;;  %v1734_v13 = vmov 0   ;;  %vm400_vm0 = vcmask 891904   ;;  %vm353_vm1 = vcmask 900096   ;;  %vm306_vm2 = vcmask 908288   ;;  %s2376_s0 = inlined_call_operand.vmem [shape: f32[8,1024], index: 0, kind: input, shape index: {}]   ;;  %s2377_s2 = inlined_call_operand.vmem [shape: bf16[8,72], index: 2, kind: input, shape index: {}]   ;;  %s2378_s1 = inlined_call_operand.vmem [shape: f32[1,768], index: 1, kind: input, shape index: {}]   ;;  %s2379_s4 = inlined_call_operand.vmem [shape: f32[8,1], index: 4, kind: input, shape index: {}]   ;;  %s2380_s5 = inlined_call_operand.vmem [shape: f32[8,1], index: 5, kind: input, shape index: {}]   ;;  %s2381_s3 = inlined_call_operand.vmem [shape: bf16[8,72], index: 3, kind: input, shape index: {}]   ;;  %s2382_s6 = inlined_call_operand.vmem [shape: f32[8,1], index: 6, kind: input, shape index: {}]   ;;  %s2383_s7 = inlined_call_operand.vmem [shape: f32[8,1], index: 7, kind: input, shape index: {}]   ;;  %s2384_s8 = inlined_call_operand.vmem [shape: f32[8,768], index: 8, kind: output, shape index: {}]  }
   0x1   :  { %v1784_v0 = vld [vmem:[%s2376_s0 + $0x8] sm:$0xff]  ;;  %v1789_v1 = vld [vmem:[%s2376_s0 + $0x10] sm:$0xff]  ;;  %v1794_v2 = vld [vmem:[%s2376_s0 + $0x18] sm:$0xff]  ;;  %s1728_s15 = smov 110   ;;  %s1729_s16 = smov 127   ;;  %559 = vmatprep.mubr.bf16.mxu0 %v1734_v13  ;;  %600 = vmatprep.mubr.bf16.mxu1 %v1734_v13  ;;  %vm508_vm3 = vcmask 1043456  }
   0x2   :  { %v1480_v3 = vpack.i.bf16 %v1789_v1, %v1784_v0  ;;  %v1490_v4 = vpack.i.bf16 %v1794_v2, %v1789_v1  ;;  %v1803_v5 = vld [vmem:[%s2376_s0 + $0x20] sm:$0xff]  ;;  %s1730_s19 = smov 1   ;;  %s1731_s20 = smov 17   ;;  %v1828_v10 = vld [vmem:[%s2376_s0 + $0x28] sm:$0xff]  ;;  %v1833_v11 = vld [vmem:[%s2376_s0 + $0x30] sm:$0xff]  ;;  %1600 = vset.pattern.permute.xlu0 %v1734_v13  ;;  %1601 = vset.pattern.permute.xlu1 %v1734_v13  ;;  %vm259_vm4 = vcmask 1039360  }
   0x3   :  { %v1485_v6 = vpack.i.bf16 %v1803_v5, %v1794_v2  ;;  %v1505_v7 = vpack.i.bf16 %v1803_v5, %v1784_v0  ;;  %v172_v8 = vld [vmem:[%s2376_s0] sm:$0xff]  ;;  %s1732_s25 = smov 18   ;;  %s1733_s26 = smov 19   ;;  %v1550_v12 = vpack.i.bf16 %v1833_v11, %v1828_v10  ;;  %v378_v14 = vld [vmem:[%s2376_s0 + $0x38] sm:$0xff]  ;;  %v1580_v15 = vpack.i.bf16 %v1828_v10, %v1803_v5 }
   0x4   :  { %1481 = vrot.lane.b32.xlu0 %v1480_v3, %s1726_s13  ;;  %1491 = vrot.lane.b32.xlu1 %v1490_v4, %s1727_s14  ;;  %v1535_v9 = vpack.i.bf16 %v1794_v2, %v172_v8  ;;  %vm153_vm5 = vcmask 138240   ;;  %vm200_vm6 = vcmask 7168   ;;  %vm59_vm7 = vcmask 154624  }
   0x5   :  { %vm106_vm8 = vcmask 146432   ;;  %vm504_vm9 = vcmask 588800  }
   0x8   :  { %1486 = vrot.lane.b32.xlu0 %v1485_v6, %s1726_s13  ;;  %1496 = vrot.lane.b32.xlu1 %v1490_v4, %s1728_s15 }
   0xc   :  { %1506 = vrot.lane.b32.xlu1 %v1505_v7, %s1728_s15  ;;  %1501 = vrot.lane.b32.xlu0 %v1505_v7, %s1727_s14 }
  0x10   :  { %1511 = vrot.lane.b32.xlu0 %v1490_v4, %s1729_s16  ;;  %1516 = vrot.lane.b32.xlu1 %v1505_v7, %s1729_s16 }
  0x14   :  { %1526 = vrot.lane.b32.xlu1 %v1480_v3, %s1730_s19  ;;  %1521 = vrot.lane.b32.xlu0 %v1480_v3, %s1731_s20 }
  0x18   :  { %1536 = vrot.lane.b32.xlu1 %v1535_v9, %s1730_s19  ;;  %1531 = vrot.lane.b32.xlu0 %v1535_v9, %s1731_s20 }
  0x1c   :  { %1546 = vrot.lane.b32.xlu1 %v1480_v3, %s1732_s25  ;;  %1541 = vrot.lane.b32.xlu0 %v1480_v3, %s1733_s26 }
  0x20   :  { %1551 = vrot.lane.b32.xlu0 %v1550_v12, %s1726_s13  ;;  %1556 = vrot.lane.b32.xlu1 %v1535_v9, %s1733_s26 }
  0x24   :  { %1561 = vrot.lane.b32.xlu0 %v1535_v9, %s1732_s25  ;;  %1566 = vrot.lane.b32.xlu1 %v1550_v12, %s1727_s14 }
  0x28   :  { %1571 = vrot.lane.b32.xlu0 %v1550_v12, %s1728_s15  ;;  %398 = vrot.lane.b32.xlu1 %v378_v14, %s1726_s13 }
  0x2c   :  { %1576 = vrot.lane.b32.xlu0 %v1550_v12, %s1729_s16  ;;  %304 = vrot.lane.b32.xlu1 %v378_v14, %s1727_s14 }
  0x30   :  { %351 = vrot.lane.b32.xlu0 %v378_v14, %s1728_s15  ;;  %1581 = vrot.lane.b32.xlu1 %v1580_v15, %s1731_s20 }
  0x34   :  { %1586 = vrot.lane.b32.xlu0 %v1580_v15, %s1730_s19  ;;  %257 = vrot.lane.b32.xlu1 %v378_v14, %s1729_s16 }
  0x38   :  { %1591 = vrot.lane.b32.xlu0 %v1580_v15, %s1733_s26  ;;  %100 = vrot.lane.b32.xlu1 %v1803_v5, %s1732_s25 }
  0x3c   :  { %151 = vrot.lane.b32.xlu0 %v1833_v11, %s1731_s20  ;;  %198 = vrot.lane.b32.xlu1 %v1833_v11, %s1730_s19 }
  0x40   :  { %57 = vrot.lane.b32.xlu0 %v1833_v11, %s1733_s26  ;;  %1596 = vrot.lane.b32.xlu1 %v1550_v12, %s1732_s25 }
  0x76   :  { %v1482_v16 = vpop.permute.xlu0 %1481  ;;  %v1870_v17 = vpop.permute.xlu1 %1491 }
  0x77   :  { %v1484_v18 = vunpack.i.h.bf16 %v1482_v16  ;;  %v1483_v19 = vunpack.i.l.bf16 %v1482_v16  ;;  %v1494_v21 = vunpack.i.h.bf16 %v1870_v17  ;;  %v1493_v24 = vunpack.i.l.bf16 %v1870_v17 }
  0x79   :  { %v401_v20 = vsel %vm400_vm0, %v1483_v19, %v1484_v18  ;;  %v308_v36 = vsel %vm306_vm2, %v1493_v24, %v1494_v21 }
  0x7a   :  { %v1874_v22 = vpop.permute.xlu0 %1486  ;;  %v1876_v23 = vpop.permute.xlu1 %1496  ;;  %v498_v28 = vpack.c.bf16 %v401_v20, %v401_v20 }
  0x7b   :  { %v1488_v25 = vunpack.i.l.bf16 %v1874_v22  ;;  %v1499_v26 = vunpack.i.h.bf16 %v1876_v23  ;;  %v1498_v27 = vunpack.i.l.bf16 %v1876_v23 }
  0x7c   :  { %v510_v37 = vsel %vm508_vm3, %v498_v28, 0 }
  0x7d   :  { %v402_v29 = vsel %vm400_vm0, %v1484_v18, %v1488_v25  ;;  %v355_v30 = vsel %vm353_vm1, %v1498_v27, %v1499_v26 }
  0x7e   :  { %v1888_v31 = vpop.permute.xlu1 %1506  ;;  %v1890_v32 = vpop.permute.xlu0 %1501  ;;  %v499_v33 = vpack.c.bf16 %v402_v29, %v402_v29  ;;  %v493_v38 = vpack.c.bf16 %v355_v30, %v308_v36 }
  0x7f   :  { %v1508_v34 = vunpack.i.l.bf16 %v1888_v31  ;;  %v1503_v35 = vunpack.i.l.bf16 %v1890_v32 }
  0x80   :  { %1458 = vmatprep.subr.msk.bf16.mxu0 %vm508_vm3, %v499_v33 }
  0x81   :  { %534 = vmatpush1.bf16.msra.mxu0 %v510_v37  ;;  %v307_v39 = vsel %vm306_vm2, %v1503_v35, %v1493_v24  ;;  %v354_v40 = vsel %vm353_vm1, %v1508_v34, %v1498_v27  ;;  %v1504_v37 = vunpack.i.h.bf16 %v1890_v32 }
  0x82   :  { %535 = vmatprep.subr.bf16.mxu0 %v493_v38  ;;  %v1901_v41 = vpop.permute.xlu0 %1511  ;;  %v1903_v42 = vpop.permute.xlu1 %1516  ;;  %v492_v43 = vpack.c.bf16 %v354_v40, %v307_v39 }
  0x83   :  { %v1514_v44 = vunpack.i.h.bf16 %v1901_v41  ;;  %v1513_v45 = vunpack.i.l.bf16 %v1901_v41  ;;  %v1518_v46 = vunpack.i.l.bf16 %v1903_v42 }
  0x85   :  { %536 = vmatpush1.bf16.msra.mxu0 %v492_v43  ;;  %v261_v47 = vsel %vm259_vm4, %v1513_v45, %v1514_v44  ;;  %v260_v48 = vsel %vm259_vm4, %v1518_v46, %v1513_v45 }
  0x86   :  { %v1912_v49 = vpop.permute.xlu1 %1526  ;;  %v1914_v50 = vpop.permute.xlu0 %1521  ;;  %v487_v51 = vpack.c.bf16 %v261_v47, %v1789_v1  ;;  %v486_v52 = vpack.c.bf16 %v260_v48, %v1784_v0  ;;  %v1489_v0 = vunpack.i.h.bf16 %v1874_v22 }
  0x87   :  { %v1529_v53 = vunpack.i.h.bf16 %v1912_v49  ;;  %v1528_v54 = vunpack.i.l.bf16 %v1912_v49  ;;  %v1524_v55 = vunpack.i.h.bf16 %v1914_v50  ;;  %v1523_v56 = vunpack.i.l.bf16 %v1914_v50 }
  0x88   :  { %537 = vmatprep.subr.bf16.mxu0 %v487_v51  ;;  %v403_v18 = vsel %vm400_vm0, %v1488_v25, %v1489_v0  ;;  %v1509_v25 = vunpack.i.h.bf16 %v1888_v31 }
  0x89   :  { %538 = vmatpush1.bf16.msra.mxu0 %v486_v52  ;;  %v155_v57 = vsel %vm153_vm5, %v1523_v56, %v1524_v55  ;;  %v202_v58 = vsel %vm200_vm6, %v1528_v54, %v1529_v53  ;;  %v500_v29 = vpack.c.bf16 %v403_v18, %v403_v18  ;;  %v1519_v52 = vunpack.i.h.bf16 %v1903_v42 }
  0x8a   :  { %v1928_v59 = vpop.permute.xlu1 %1536  ;;  %v1930_v60 = vpop.permute.xlu0 %1531  ;;  %v481_v61 = vpack.c.bf16 %v202_v58, %v155_v57  ;;  %v309_v57 = vsel %vm306_vm2, %v1494_v21, %v1504_v37  ;;  %v356_v58 = vsel %vm353_vm1, %v1499_v26, %v1509_v25 }
  0x8b   :  { %v1538_v62 = vunpack.i.l.bf16 %v1928_v59  ;;  %v1533_v63 = vunpack.i.l.bf16 %v1930_v60  ;;  %v516_v38 = vsel %vm508_vm3, %v500_v29, 0  ;;  %v494_v21 = vpack.c.bf16 %v356_v58, %v309_v57 }
  0x8c   :  { %539 = vmatprep.subr.bf16.mxu0 %v481_v61  ;;  %v262_v26 = vsel %vm259_vm4, %v1514_v44, %v1519_v52  ;;  %v1539_v44 = vunpack.i.h.bf16 %v1928_v59 }
  0x8d   :  { %v154_v1 = vsel %vm153_vm5, %v1533_v63, %v1523_v56  ;;  %v201_v3 = vsel %vm200_vm6, %v1538_v62, %v1528_v54  ;;  %v1973_v56 = vld [vmem:[%s2377_s2] sm:$0xf]  ;;  %v488_v41 = vpack.c.bf16 %v262_v26, %v1794_v2  ;;  %v653_v26 = vlaneseq }
  0x8e   :  { %v1937_v4 = vpop.permute.xlu1 %1546  ;;  %v1939_v6 = vpop.permute.xlu0 %1541  ;;  %v480_v7 = vpack.c.bf16 %v201_v3, %v154_v1 }
  0x8f   :  { %v1549_v8 = vunpack.i.h.bf16 %v1937_v4  ;;  %v1548_v9 = vunpack.i.l.bf16 %v1937_v4  ;;  %v1544_v12 = vunpack.i.h.bf16 %v1939_v6  ;;  %v1543_v14 = vunpack.i.l.bf16 %v1939_v6 }
  0x90   :  { %540 = vmatpush1.bf16.msra.mxu0 %v480_v7 }
  0x91   :  { %v61_v15 = vsel %vm59_vm7, %v1543_v14, %v1544_v12  ;;  %v108_v16 = vsel %vm106_vm8, %v1548_v9, %v1549_v8 }
  0x92   :  { %v1552_v19 = vpop.permute.xlu0 %1551  ;;  %v1954_v20 = vpop.permute.xlu1 %1556  ;;  %v475_v24 = vpack.c.bf16 %v108_v16, %v61_v15 }
  0x93   :  { %v1553_v27 = vunpack.i.l.bf16 %v1552_v19  ;;  %v1554_v28 = vunpack.i.h.bf16 %v1552_v19  ;;  %v1558_v30 = vunpack.i.l.bf16 %v1954_v20 }
  0x94   :  { %541 = vmatprep.subr.bf16.mxu0 %v475_v24 }
  0x95   :  { %v404_v33 = vsel %vm400_vm0, %v1489_v0, %v1553_v27  ;;  %v405_v39 = vsel %vm400_vm0, %v1553_v27, %v1554_v28  ;;  %v60_v43 = vsel %vm59_vm7, %v1558_v30, %v1543_v14  ;;  %v1534_v27 = vunpack.i.h.bf16 %v1930_v60 }
  0x96   :  { %v1958_v34 = vpop.permute.xlu0 %1561  ;;  %v1567_v35 = vpop.permute.xlu1 %1566  ;;  %v501_v36 = vpack.c.bf16 %v404_v33, %v404_v33  ;;  %v502_v32 = vpack.c.bf16 %v405_v39, %v405_v39 }
  0x97   :  { %v1563_v22 = vunpack.i.l.bf16 %v1958_v34  ;;  %v1568_v40 = vunpack.i.l.bf16 %v1567_v35  ;;  %v1569_v23 = vunpack.i.h.bf16 %v1567_v35  ;;  %v1564_v2 = vunpack.i.h.bf16 %v1958_v34 }
  0x98   :  { %1460 = vmatprep.subr.msk.bf16.mxu1 %vm508_vm3, %v501_v36  ;;  %v522_v17 = vsel %vm508_vm3, %v502_v32, 0  ;;  %v156_v60 = vsel %vm153_vm5, %v1524_v55, %v1534_v27 }
  0x99   :  { %575 = vmatpush1.bf16.msra.mxu1 %v516_v38  ;;  %v107_v45 = vsel %vm106_vm8, %v1563_v22, %v1548_v9  ;;  %v310_v61 = vsel %vm306_vm2, %v1504_v37, %v1568_v40  ;;  %v203_v37 = vsel %vm200_vm6, %v1529_v53, %v1539_v44 }
  0x9a   :  { %v1572_v46 = vpop.permute.xlu0 %1571  ;;  %v399_v47 = vpop.permute.xlu1 %398  ;;  %v474_v48 = vpack.c.bf16 %v107_v45, %v60_v43  ;;  %v1559_v43 = vunpack.i.h.bf16 %v1954_v20  ;;  %v482_v55 = vpack.c.bf16 %v203_v37, %v156_v60 }
  0x9b   :  { %v1573_v51 = vunpack.i.l.bf16 %v1572_v46  ;;  %v406_v31 = vsel %vm400_vm0, %v1554_v28, %v399_v47  ;;  %v1574_v42 = vunpack.i.h.bf16 %v1572_v46  ;;  %v311_v28 = vsel %vm306_vm2, %v1568_v40, %v1569_v23 }
  0x9c   :  { %v503_v54 = vpack.c.bf16 %v406_v31, %v406_v31  ;;  %542 = vmatpush1.bf16.msra.mxu0 %v474_v48  ;;  %v62_v32 = vsel %vm59_vm7, %v1544_v12, %v1559_v43 }
  0x9d   :  { %v357_v62 = vsel %vm353_vm1, %v1509_v25, %v1573_v51  ;;  %v358_v9 = vsel %vm353_vm1, %v1573_v51, %v1574_v42 }
  0x9e   :  { %v1577_v63 = vpop.permute.xlu0 %1576  ;;  %v305_v0 = vpop.permute.xlu1 %304  ;;  %1462 = vmatprep.subr.msk.bf16.mxu0 %vm508_vm3, %v503_v54  ;;  %v495_v1 = vpack.c.bf16 %v357_v62, %v310_v61  ;;  %v496_v30 = vpack.c.bf16 %v358_v9, %v311_v28 }
  0x9f   :  { %v1578_v3 = vunpack.i.l.bf16 %v1577_v63  ;;  %1459 = vmatmul.mubr.msk.bf16.vlgmr.msra.gmra.mxu0 %vm504_vm9, %v1973_v56  ;;  %v1579_v14 = vunpack.i.h.bf16 %v1577_v63  ;;  %v312_v19 = vsel %vm306_vm2, %v1569_v23, %v305_v0 }
  0xa0   :  { %576 = vmatprep.subr.bf16.mxu1 %v495_v1  ;;  %616 = vmatpush1.bf16.msra.mxu0 %v522_v17 }
  0xa1   :  { %577 = vmatpush1.bf16.msra.mxu1 %v494_v21  ;;  %v263_v7 = vsel %vm259_vm4, %v1519_v52, %v1578_v3  ;;  %641 = vmatprep.mubr.bf16.mxu0 %v1734_v13  ;;  %v264_v35 = vsel %vm259_vm4, %v1578_v3, %v1579_v14 }
  0xa2   :  { %v352_v15 = vpop.permute.xlu0 %351  ;;  %v1582_v16 = vpop.permute.xlu1 %1581  ;;  %v489_v18 = vpack.c.bf16 %v263_v7, %v1803_v5  ;;  %v490_v38 = vpack.c.bf16 %v264_v35, %v1828_v10  ;;  %v109_v10 = vsel %vm106_vm8, %v1549_v8, %v1564_v2 }
  0xa3   :  { %v359_v24 = vsel %vm353_vm1, %v1574_v42, %v352_v15  ;;  %v1583_v33 = vunpack.i.l.bf16 %v1582_v16  ;;  %v1584_v47 = vunpack.i.h.bf16 %v1582_v16  ;;  %v476_v54 = vpack.c.bf16 %v109_v10, %v62_v32 }
  0xa4   :  { %v497_v29 = vpack.c.bf16 %v359_v24, %v312_v19  ;;  %578 = vmatprep.subr.bf16.mxu1 %v489_v18  ;;  %v30_v19 = vld [vmem:[%s2378_s1] sm:$0x3f] }
  0xa5   :  { %579 = vmatpush1.bf16.msra.mxu1 %v488_v41  ;;  %v157_v39 = vsel %vm153_vm5, %v1534_v27, %v1583_v33  ;;  %v158_v8 = vsel %vm153_vm5, %v1583_v33, %v1584_v47 }
  0xa6   :  { %v1587_v5 = vpop.permute.xlu0 %1586  ;;  %v258_v36 = vpop.permute.xlu1 %257  ;;  %617 = vmatprep.subr.bf16.mxu0 %v497_v29 }
  0xa7   :  { %v1588_v22 = vunpack.i.l.bf16 %v1587_v5  ;;  %v265_v25 = vsel %vm259_vm4, %v1579_v14, %v258_v36  ;;  %618 = vmatpush1.bf16.msra.mxu0 %v496_v30  ;;  %v1589_v45 = vunpack.i.h.bf16 %v1587_v5  ;;  %v654_v14 = vshrl.u32 %v653_v26, 7 }
  0xa8   :  { %v491_v59 = vpack.c.bf16 %v265_v25, %v1833_v11  ;;  %v1735_v26 = vmov 0.0  }
  0xa9   :  { %v204_v40 = vsel %vm200_vm6, %v1539_v44, %v1588_v22  ;;  %v205_v20 = vsel %vm200_vm6, %v1588_v22, %v1589_v45  ;;  %v655_v16 = vsub.s32 0, %v654_v14  ;;  %v659_v18 = vsub.s32 1, %v654_v14 }
  0xaa   :  { %v1592_v34 = vpop.permute.xlu0 %1591  ;;  %v101_v46 = vpop.permute.xlu1 %100  ;;  %619 = vmatprep.subr.bf16.mxu0 %v491_v59  ;;  %v483_v11 = vpack.c.bf16 %v204_v40, %v157_v39  ;;  %v484_v58 = vpack.c.bf16 %v205_v20, %v158_v8  ;;  %v667_v44 = vsub.s32 3, %v654_v14  ;;  %v671_v22 = vsub.s32 4, %v654_v14 }
  0xab   :  { %v1593_v50 = vunpack.i.l.bf16 %v1592_v34  ;;  %620 = vmatpush1.bf16.msra.mxu0 %v490_v38  ;;  %v110_v53 = vsel %vm106_vm8, %v1564_v2, %v101_v46  ;;  %v1594_v61 = vunpack.i.h.bf16 %v1592_v34  ;;  %v2043_v24 = vrot.slane %v30_v19, %v655_v16 }
  0xac   :  { %580 = vmatprep.subr.bf16.mxu1 %v483_v11  ;;  %v2045_v41 = vrot.slane %v30_v19, %v659_v18  ;;  %v2053_v30 = vrot.slane %v30_v19, %v667_v44  ;;  %v675_v37 = vsub.s32 5, %v654_v14 }
  0xad   :  { %v63_v49 = vsel %vm59_vm7, %v1559_v43, %v1593_v50  ;;  %581 = vmatpush1.bf16.msra.mxu1 %v482_v55  ;;  %v64_v6 = vsel %vm59_vm7, %v1593_v50, %v1594_v61  ;;  %v2059_v43 = vrot.slane %v30_v19, %v671_v22 }
  0xae   :  { %v477_v48 = vpack.c.bf16 %v110_v53, %v63_v49  ;;  %v152_v51 = vpop.permute.xlu0 %151  ;;  %v199_v31 = vpop.permute.xlu1 %198  ;;  %v2061_v11 = vrot.slane %v30_v19, %v675_v37 }
  0xaf   :  { %v159_v52 = vsel %vm153_vm5, %v1584_v47, %v152_v51  ;;  %v206_v4 = vsel %vm200_vm6, %v1589_v45, %v199_v31 }
  0xb0   :  { %v485_v57 = vpack.c.bf16 %v206_v4, %v159_v52  ;;  %582 = vmatprep.subr.bf16.mxu1 %v477_v48 }
  0xb1   :  { %583 = vmatpush1.bf16.msra.mxu1 %v476_v54 }
  0xb2   :  { %v58_v62 = vpop.permute.xlu0 %57  ;;  %v1597_v42 = vpop.permute.xlu1 %1596  ;;  %621 = vmatprep.subr.bf16.mxu0 %v485_v57 }
  0xb3   :  { %v1599_v63 = vunpack.i.h.bf16 %v1597_v42  ;;  %v1598_v0 = vunpack.i.l.bf16 %v1597_v42  ;;  %622 = vmatpush1.bf16.msra.mxu0 %v484_v58  ;;  %v65_v12 = vsel %vm59_vm7, %v1594_v61, %v58_v62 }
  0xb4   :  { %1461 = vmatmul.mubr.msk.bf16.vlgmr.msra.gmra.mxu1 %vm504_vm9, %v1973_v56 }
  0xb5   :  { %v111_v1 = vsel %vm106_vm8, %v101_v46, %v1598_v0  ;;  %v112_v3 = vsel %vm106_vm8, %v1598_v0, %v1599_v63  ;;  %1279 = vmatprep.mubr.bf16.mxu1 %v1734_v13 }
  0xb6   :  { %v478_v17 = vpack.c.bf16 %v111_v1, %v64_v6  ;;  %v479_v21 = vpack.c.bf16 %v112_v3, %v65_v12  ;;  %v650_v6 = vld [vmem:[%s2379_s4] sm:$0xff] }
  0xb7   :  { %v651_v3 = vld [vmem:[%s2380_s5] sm:$0xff] }
  0xb8   :  { %623 = vmatprep.subr.bf16.mxu0 %v479_v21 }
  0xb9   :  { %624 = vmatpush1.bf16.msra.mxu0 %v478_v17 }
  0xbc   :  { %1463 = vmatmul.mubr.msk.bf16.vlgmr.msra.gmra.mxu0 %vm504_vm9, %v1973_v56  ;;  %v663_v56 = vsub.s32 2, %v654_v14 }
  0xbd   :  { %1320 = vmatprep.mubr.bf16.mxu0 %v1734_v13 }
  0xbe   :  { %v2051_v29 = vrot.slane %v30_v19, %v663_v56 }
 0x15f   :  { %v2036_v23 = vpop.f32.mrf.mxu0 }
 0x160   :  { %v683_v27 = vmul.f32 %v2043_v24, %v2036_v23 }
 0x161   :  { %v2038_v7 = vpop.f32.mrf.mxu0 }
 0x162   :  { %v684_v28 = vmul.f32 %v2045_v41, %v2038_v7  ;;  %v697_v35 = vmul.f32 %v683_v27, %v2036_v23 }
 0x163   :  { %v565_v9 = vpop.f32.mrf.mxu0 }
 0x164   :  { %v698_v5 = vmul.f32 %v684_v28, %v2038_v7  ;;  %v689_v2 = vadd.f32 %v684_v28, %v683_v27 }
 0x165   :  { %v566_v15 = vpop.f32.mrf.mxu0 }
 0x166   :  { %v703_v39 = vadd.f32 %v698_v5, %v697_v35 }
 0x174   :  { %v602_v33 = vpop.f32.mrf.mxu1 }
 0x175   :  { %v685_v36 = vmul.f32 %v2051_v29, %v602_v33 }
 0x176   :  { %v604_v25 = vpop.f32.mrf.mxu1 }
 0x177   :  { %v699_v59 = vmul.f32 %v685_v36, %v602_v33  ;;  %v686_v60 = vmul.f32 %v2053_v30, %v604_v25  ;;  %v690_v40 = vadd.f32 %v689_v2, %v685_v36 }
 0x178   :  { %v606_v38 = vpop.f32.mrf.mxu1 }
 0x179   :  { %v704_v34 = vadd.f32 %v703_v39, %v699_v59  ;;  %v700_v46 = vmul.f32 %v686_v60, %v604_v25  ;;  %v691_v47 = vadd.f32 %v690_v40, %v686_v60 }
 0x17a   :  { %v607_v45 = vpop.f32.mrf.mxu1 }
 0x17b   :  { %v705_v48 = vadd.f32 %v704_v34, %v700_v46 }
 0x17c   :  { %v643_v50 = vpop.f32.mrf.mxu0 }
 0x17d   :  { %v687_v55 = vmul.f32 %v2059_v43, %v643_v50 }
 0x17e   :  { %v645_v10 = vpop.f32.mrf.mxu0 }
 0x17f   :  { %v701_v49 = vmul.f32 %v687_v55, %v643_v50  ;;  %v688_v53 = vmul.f32 %v2061_v11, %v645_v10  ;;  %v692_v20 = vadd.f32 %v691_v47, %v687_v55 }
 0x180   :  { %v647_v51 = vpop.f32.mrf.mxu0 }
 0x181   :  { %v693_v31 = vadd.f32 %v692_v20, %v688_v53  ;;  %v702_v32 = vmul.f32 %v688_v53, %v645_v10  ;;  %v706_v52 = vadd.f32 %v705_v48, %v701_v49 }
 0x182   :  { %v648_v4 = vpop.f32.mrf.mxu0 }
 0x183   :  { %694 = vadd.xlane.f32.xlu0 %v693_v31  ;;  %v707_v54 = vadd.f32 %v706_v52, %v702_v32 }
 0x185   :  { %708 = vadd.xlane.f32.xlu1 %v707_v54 }
 0x20c   :  { %v695_v8 = vpop.xlane.xlu0 %694 }
 0x20d   :  { %v696_v57 = vmul.f32 0.001953125, %v695_v8 }
 0x20e   :  { %v709_v58 = vpop.xlane.xlu1 %708 }
 0x20f   :  { %v711_v61 = vmul.f32 %v696_v57, %v696_v57  ;;  %v710_v62 = vmul.f32 0.001953125, %v709_v58 }
 0x211   :  { %v712_v42 = vsub.f32 %v710_v62, %v711_v61 }
 0x213   :  { %v713_v63 = vmax.f32 %v712_v42, 0.0 }
 0x215   :  { %v714_v0 = vadd.f32 1e-05, %v713_v63 }
 0x217   :  { %1722 = vrsqrt.f32 %v714_v0 }
 0x224   :  { %v1723_v12 = vpop.eup %1722 }
 0x225   :  { %v716_v1 = vmul.f32 %v1723_v12, %v650_v6 }
 0x227   :  { %721 = vperm.xlu0 %1600, %v716_v1   ;;  %v717_v17 = vmul.f32 %v716_v1, %v696_v57 }
 0x229   :  { %v718_v21 = vsub.f32 %v651_v3, %v717_v17 }
 0x22b   :  { %732 = vperm.xlu1 %1601, %v718_v21   ;;  %1075 = vrot.lane.b32.xlu0 %v1735_v26, %s1728_s15 }
 0x22f   :  { %1121 = vrot.lane.b32.xlu1 %v1735_v26, %s1726_s13 }
 0x233   :  { %1029 = vrot.lane.b32.xlu1 %v1735_v26, %s1727_s14 }
 0x237   :  { %983 = vrot.lane.b32.xlu1 %v1735_v26, %s1729_s16 }
 0x2a2   :  { %v722_v9 = vpop.permute.xlu0 %721 }
 0x2a3   :  { %v724_v14 = vmul.f32 %v722_v9, %v2036_v23  ;;  %v725_v15 = vmul.f32 %v722_v9, %v2038_v7  ;;  %v726_v16 = vmul.f32 %v722_v9, %v602_v33  ;;  %v727_v18 = vmul.f32 %v722_v9, %v604_v25 }
 0x2a4   :  { %v728_v60 = vmul.f32 %v722_v9, %v643_v50  ;;  %v729_v37 = vmul.f32 %v722_v9, %v645_v10 }
 0x2a6   :  { %v733_v19 = vpop.permute.xlu1 %732  ;;  %v2144_v48 = vpop.permute.xlu0 %1075 }
 0x2a7   :  { %v735_v56 = vadd.f32 %v733_v19, %v724_v14  ;;  %v736_v44 = vadd.f32 %v733_v19, %v725_v15  ;;  %v737_v27 = vadd.f32 %v733_v19, %v726_v16  ;;  %v738_v28 = vadd.f32 %v733_v19, %v727_v18 }
 0x2a8   :  { %v739_v38 = vadd.f32 %v733_v19, %v728_v60  ;;  %v740_v39 = vadd.f32 %v733_v19, %v729_v37 }
 0x2a9   :  { %v741_v35 = vmax.f32 %v735_v56, 0.0  ;;  %v742_v5 = vmax.f32 %v736_v44, 0.0  ;;  %v743_v36 = vmax.f32 %v737_v27, 0.0  ;;  %v744_v22 = vmax.f32 %v738_v28, 0.0 }
 0x2aa   :  { %v745_v45 = vmax.f32 %v739_v38, 0.0  ;;  %v746_v34 = vmax.f32 %v740_v39, 0.0  ;;  %v2140_v53 = vpop.permute.xlu1 %1121 }
 0x2ab   :  { %v2078_v2 = vmul.f32 %v741_v35, %v2043_v24  ;;  %v2081_v59 = vmul.f32 %v742_v5, %v2045_v41  ;;  %v2084_v23 = vmul.f32 %v743_v36, %v2051_v29  ;;  %v2087_v7 = vmul.f32 %v744_v22, %v2053_v30 }
 0x2ac   :  { %v2103_v50 = vmul.f32 %v745_v45, %v2059_v43  ;;  %v2106_v55 = vmul.f32 %v746_v34, %v2061_v11 }
 0x2ad   :  { %v1632_v33 = vpack.i.bf16 %v2084_v23, %v2081_v59  ;;  %v1602_v25 = vpack.i.bf16 %v2081_v59, %v2078_v2  ;;  %v1607_v40 = vpack.i.bf16 %v2087_v7, %v2084_v23  ;;  %v1652_v46 = vpack.i.bf16 %v2084_v23, %v1735_v26 }
 0x2ae   :  { %v1672_v47 = vpack.i.bf16 %v2106_v55, %v2103_v50  ;;  %v1622_v10 = vpack.i.bf16 %v2087_v7, %v2078_v2  ;;  %v1707_v49 = vpack.i.bf16 %v2103_v50, %v2087_v7  ;;  %v2142_v20 = vpop.permute.xlu1 %1029 }
 0x2af   :  { %1633 = vrot.lane.b32.xlu0 %v1632_v33, %s1729_s16  ;;  %1603 = vrot.lane.b32.xlu1 %v1602_v25, %s1726_s13 }
 0x2b2   :  { %v2146_v51 = vpop.permute.xlu1 %983 }
 0x2b3   :  { %1643 = vrot.lane.b32.xlu0 %v1602_v25, %s1731_s20  ;;  %1608 = vrot.lane.b32.xlu1 %v1607_v40, %s1726_s13 }
 0x2b7   :  { %1653 = vrot.lane.b32.xlu0 %v1652_v46, %s1731_s20  ;;  %1613 = vrot.lane.b32.xlu1 %v1632_v33, %s1727_s14 }
 0x2bb   :  { %1663 = vrot.lane.b32.xlu0 %v1602_v25, %s1733_s26  ;;  %1618 = vrot.lane.b32.xlu1 %v1632_v33, %s1728_s15 }
 0x2bf   :  { %1673 = vrot.lane.b32.xlu0 %v1672_v47, %s1726_s13  ;;  %1623 = vrot.lane.b32.xlu1 %v1622_v10, %s1727_s14 }
 0x2c3   :  { %1683 = vrot.lane.b32.xlu0 %v1652_v46, %s1732_s25  ;;  %1628 = vrot.lane.b32.xlu1 %v1622_v10, %s1728_s15 }
 0x2c7   :  { %1693 = vrot.lane.b32.xlu0 %v1672_v47, %s1728_s15  ;;  %1638 = vrot.lane.b32.xlu1 %v1622_v10, %s1729_s16 }
 0x2cb   :  { %1698 = vrot.lane.b32.xlu0 %v1672_v47, %s1729_s16  ;;  %1648 = vrot.lane.b32.xlu1 %v1602_v25, %s1730_s19 }
 0x2cf   :  { %1708 = vrot.lane.b32.xlu0 %v1707_v49, %s1730_s19  ;;  %1658 = vrot.lane.b32.xlu1 %v1652_v46, %s1730_s19 }
 0x2d3   :  { %1713 = vrot.lane.b32.xlu0 %v1707_v49, %s1733_s26  ;;  %1668 = vrot.lane.b32.xlu1 %v1602_v25, %s1732_s25 }
 0x2d7   :  { %879 = vrot.lane.b32.xlu0 %v2106_v55, %s1731_s20  ;;  %1678 = vrot.lane.b32.xlu1 %v1652_v46, %s1733_s26 }
 0x2db   :  { %787 = vrot.lane.b32.xlu0 %v2106_v55, %s1733_s26  ;;  %1688 = vrot.lane.b32.xlu1 %v1672_v47, %s1727_s14 }
 0x2df   :  { %1703 = vrot.lane.b32.xlu1 %v1707_v49, %s1731_s20 }
 0x2e3   :  { %829 = vrot.lane.b32.xlu1 %v2087_v7, %s1732_s25 }
 0x2e7   :  { %925 = vrot.lane.b32.xlu1 %v2106_v55, %s1730_s19 }
 0x2eb   :  { %1718 = vrot.lane.b32.xlu1 %v1672_v47, %s1732_s25 }
 0x321   :  { %v2148_v31 = vpop.permute.xlu0 %1633  ;;  %v1604_v32 = vpop.permute.xlu1 %1603 }
 0x322   :  { %v1606_v52 = vunpack.i.h.bf16 %v1604_v32  ;;  %v1605_v4 = vunpack.i.l.bf16 %v1604_v32  ;;  %v1636_v27 = vunpack.i.h.bf16 %v2148_v31  ;;  %v1635_v28 = vunpack.i.l.bf16 %v2148_v31 }
 0x324   :  { %v1123_v54 = vsel %vm400_vm0, %v1605_v4, %v1606_v52  ;;  %v986_v37 = vsel %vm259_vm4, %v1635_v28, %v1636_v27 }
 0x325   :  { %v2151_v8 = vpop.permute.xlu0 %1643  ;;  %v1609_v57 = vpop.permute.xlu1 %1608  ;;  %v1220_v61 = vpack.c.bf16 %v1123_v54, %v1123_v54  ;;  %v1209_v47 = vpack.c.bf16 %v986_v37, %v2081_v59 }
 0x326   :  { %v1610_v58 = vunpack.i.l.bf16 %v1609_v57  ;;  %v1611_v12 = vunpack.i.h.bf16 %v1609_v57  ;;  %v1646_v10 = vunpack.i.h.bf16 %v2151_v8  ;;  %v1645_v49 = vunpack.i.l.bf16 %v2151_v8 }
 0x327   :  { %v1230_v6 = vsel %vm508_vm3, %v1220_v61, 0 }
 0x328   :  { %v1124_v62 = vsel %vm400_vm0, %v1606_v52, %v1610_v58  ;;  %v1125_v16 = vsel %vm400_vm0, %v1610_v58, %v1611_v12  ;;  %v882_v59 = vsel %vm153_vm5, %v1645_v49, %v1646_v10 }
 0x329   :  { %v1221_v42 = vpack.c.bf16 %v1124_v62, %v1124_v62  ;;  %v2154_v63 = vpop.permute.xlu0 %1653  ;;  %v2156_v0 = vpop.permute.xlu1 %1613  ;;  %v1222_v35 = vpack.c.bf16 %v1125_v16, %v1125_v16 }
 0x32a   :  { %v1616_v1 = vunpack.i.h.bf16 %v2156_v0  ;;  %v1615_v3 = vunpack.i.l.bf16 %v2156_v0  ;;  %v1655_v58 = vunpack.i.l.bf16 %v2154_v63 }
 0x32b   :  { %1464 = vmatprep.subr.msk.bf16.mxu1 %vm508_vm3, %v1221_v42  ;;  %v1236_v60 = vsel %vm508_vm3, %v1222_v35, 0 }
 0x32c   :  { %1254 = vmatpush1.bf16.msra.mxu1 %v1230_v6  ;;  %v1032_v14 = vsel %vm306_vm2, %v1615_v3, %v1616_v1 }
 0x32d   :  { %v2162_v17 = vpop.permute.xlu0 %1663  ;;  %v2164_v21 = vpop.permute.xlu1 %1618 }
 0x32e   :  { %v1621_v26 = vunpack.i.h.bf16 %v2164_v21  ;;  %v1620_v9 = vunpack.i.l.bf16 %v2164_v21 }
 0x330   :  { %v1078_v15 = vsel %vm353_vm1, %v1620_v9, %v1621_v26 }
 0x331   :  { %v2175_v18 = vpop.permute.xlu0 %1673  ;;  %v2177_v19 = vpop.permute.xlu1 %1623  ;;  %v1215_v56 = vpack.c.bf16 %v1078_v15, %v1032_v14 }
 0x332   :  { %v1675_v44 = vunpack.i.l.bf16 %v2175_v18  ;;  %v1625_v36 = vunpack.i.l.bf16 %v2177_v19  ;;  %v1676_v14 = vunpack.i.h.bf16 %v2175_v18 }
 0x333   :  { %1255 = vmatprep.subr.bf16.mxu1 %v1215_v56 }
 0x334   :  { %v1126_v5 = vsel %vm400_vm0, %v1611_v12, %v1675_v44  ;;  %v1031_v38 = vsel %vm306_vm2, %v1625_v36, %v1615_v3  ;;  %v881_v12 = vsel %vm153_vm5, %v1655_v58, %v1645_v49  ;;  %v1666_v3 = vunpack.i.h.bf16 %v2162_v17 }
 0x335   :  { %v1223_v22 = vpack.c.bf16 %v1126_v5, %v1126_v5  ;;  %v2184_v33 = vpop.permute.xlu1 %1628  ;;  %v2194_v40 = vpop.permute.xlu0 %1683 }
 0x336   :  { %v1630_v25 = vunpack.i.l.bf16 %v2184_v33  ;;  %v1631_v36 = vunpack.i.h.bf16 %v2184_v33 }
 0x337   :  { %1466 = vmatprep.subr.msk.bf16.mxu0 %vm508_vm3, %v1223_v22 }
 0x338   :  { %v1077_v39 = vsel %vm353_vm1, %v1630_v25, %v1620_v9  ;;  %1295 = vmatpush1.bf16.msra.mxu0 %v1236_v60  ;;  %v1665_v9 = vunpack.i.l.bf16 %v2162_v17  ;;  %v1127_v25 = vsel %vm400_vm0, %v1675_v44, %v1676_v14 }
 0x339   :  { %v1214_v45 = vpack.c.bf16 %v1077_v39, %v1031_v38  ;;  %v2196_v34 = vpop.permute.xlu1 %1638  ;;  %v2209_v61 = vpop.permute.xlu0 %1693  ;;  %v1626_v38 = vunpack.i.h.bf16 %v2177_v19  ;;  %v1685_v39 = vunpack.i.l.bf16 %v2194_v40  ;;  %v1224_v44 = vpack.c.bf16 %v1127_v25, %v1127_v25 }
 0x33a   :  { %v1640_v46 = vunpack.i.l.bf16 %v2196_v34  ;;  %v790_v22 = vsel %vm59_vm7, %v1665_v9, %v1666_v3 }
 0x33b   :  { %1256 = vmatpush1.bf16.msra.mxu1 %v1214_v45  ;;  %v1128_v45 = vsel %vm400_vm0, %v1676_v14, %v2140_v53  ;;  %v1641_v53 = vunpack.i.h.bf16 %v2196_v34  ;;  %v1242_v14 = vsel %vm508_vm3, %v1224_v44, 0 }
 0x33c   :  { %v985_v32 = vsel %vm259_vm4, %v1640_v46, %v1635_v28  ;;  %1257 = vmatprep.subr.bf16.mxu1 %v1209_v47  ;;  %v1079_v46 = vsel %vm353_vm1, %v1621_v26, %v1631_v36  ;;  %v1695_v47 = vunpack.i.l.bf16 %v2209_v61 }
 0x33d   :  { %v1208_v52 = vpack.c.bf16 %v985_v32, %v2078_v2  ;;  %v2204_v4 = vpop.permute.xlu1 %1648  ;;  %v2225_v16 = vpop.permute.xlu0 %1698  ;;  %v1696_v32 = vunpack.i.h.bf16 %v2209_v61  ;;  %v1656_v61 = vunpack.i.h.bf16 %v2154_v63 }
 0x33e   :  { %v1651_v54 = vunpack.i.h.bf16 %v2204_v4  ;;  %v1650_v57 = vunpack.i.l.bf16 %v2204_v4  ;;  %v1700_v19 = vunpack.i.l.bf16 %v2225_v16  ;;  %v1701_v21 = vunpack.i.h.bf16 %v2225_v16 }
 0x33f   :  { %1258 = vmatpush1.bf16.msra.mxu1 %v1208_v52  ;;  %v1080_v34 = vsel %vm353_vm1, %v1631_v36, %v1695_v47  ;;  %v1082_v63 = vsel %vm353_vm1, %v1696_v32, %v2144_v48  ;;  %v987_v16 = vsel %vm259_vm4, %v1636_v27, %v1641_v53  ;;  %v1081_v27 = vsel %vm353_vm1, %v1695_v47, %v1696_v32 }
 0x340   :  { %v928_v62 = vsel %vm200_vm6, %v1650_v57, %v1651_v54 }
 0x341   :  { %v2217_v2 = vpop.permute.xlu1 %1658  ;;  %v1203_v42 = vpack.c.bf16 %v928_v62, %v882_v59  ;;  %v2250_v49 = vpop.permute.xlu0 %1708  ;;  %v1225_v59 = vpack.c.bf16 %v1128_v45, %v1128_v45  ;;  %v1033_v62 = vsel %vm306_vm2, %v1616_v1, %v1626_v38 }
 0x342   :  { %v1660_v6 = vunpack.i.l.bf16 %v2217_v2  ;;  %v1710_v25 = vunpack.i.l.bf16 %v2250_v49 }
 0x343   :  { %1259 = vmatprep.subr.bf16.mxu1 %v1203_v42 }
 0x344   :  { %v927_v15 = vsel %vm200_vm6, %v1660_v6, %v1650_v57 }
 0x345   :  { %v1202_v56 = vpack.c.bf16 %v927_v15, %v881_v12  ;;  %v2227_v28 = vpop.permute.xlu1 %1668  ;;  %v1216_v12 = vpack.c.bf16 %v1079_v46, %v1033_v62  ;;  %v988_v15 = vsel %vm259_vm4, %v1641_v53, %v1700_v19 }
 0x346   :  { %v1671_v35 = vunpack.i.h.bf16 %v2227_v28  ;;  %v1670_v5 = vunpack.i.l.bf16 %v2227_v28  ;;  %v1211_v31 = vpack.c.bf16 %v988_v15, %v2087_v7 }
 0x347   :  { %1260 = vmatpush1.bf16.msra.mxu1 %v1202_v56  ;;  %v2279_v56 = vpop.permute.xlu0 %1713 }
 0x348   :  { %v836_v18 = vsel %vm106_vm8, %v1670_v5, %v1671_v35  ;;  %v835_v52 = vsel %vm106_vm8, %v1685_v39, %v1670_v5  ;;  %v989_v39 = vsel %vm259_vm4, %v1700_v19, %v1701_v21  ;;  %v883_v19 = vsel %vm153_vm5, %v1646_v10, %v1656_v61 }
 0x349   :  { %v2239_v60 = vpop.permute.xlu1 %1678  ;;  %v1197_v37 = vpack.c.bf16 %v836_v18, %v790_v22  ;;  %v990_v18 = vsel %vm259_vm4, %v1701_v21, %v2146_v51 }
 0x34a   :  { %v1680_v33 = vunpack.i.l.bf16 %v2239_v60  ;;  %v1213_v46 = vpack.c.bf16 %v990_v18, %v2106_v55  ;;  %v1711_v55 = vunpack.i.h.bf16 %v2250_v49 }
 0x34b   :  { %1261 = vmatprep.subr.bf16.mxu1 %v1197_v37  ;;  %v880_v32 = vpop.permute.xlu0 %879 }
 0x34c   :  { %v789_v57 = vsel %vm59_vm7, %v1680_v33, %v1665_v9  ;;  %v2265_v9 = vld [vmem:[%s2381_s3] sm:$0xf] }
 0x34d   :  { %v1196_v58 = vpack.c.bf16 %v835_v52, %v789_v57  ;;  %v1689_v26 = vpop.permute.xlu1 %1688 }
 0x34e   :  { %v1691_v42 = vunpack.i.h.bf16 %v1689_v26  ;;  %v1690_v6 = vunpack.i.l.bf16 %v1689_v26  ;;  %v1716_v26 = vunpack.i.h.bf16 %v2279_v56 }
 0x34f   :  { %1262 = vmatpush1.bf16.msra.mxu1 %v1196_v58  ;;  %v788_v62 = vpop.permute.xlu0 %787 }
 0x350   :  { %1468 = vmatprep.subr.msk.bf16.mxu1 %vm508_vm3, %v1225_v59  ;;  %v1034_v0 = vsel %vm306_vm2, %v1626_v38, %v1690_v6  ;;  %v1036_v1 = vsel %vm306_vm2, %v1691_v42, %v2142_v20  ;;  %v1661_v20 = vunpack.i.h.bf16 %v2217_v2  ;;  %v1035_v48 = vsel %vm306_vm2, %v1690_v6, %v1691_v42 }
 0x351   :  { %v1704_v5 = vpop.permute.xlu1 %1703  ;;  %v1217_v36 = vpack.c.bf16 %v1080_v34, %v1034_v0  ;;  %v1219_v22 = vpack.c.bf16 %v1082_v63, %v1036_v1  ;;  %v1210_v38 = vpack.c.bf16 %v987_v16, %v2084_v23  ;;  %v1686_v2 = vunpack.i.h.bf16 %v2194_v40 }
 0x352   :  { %v1705_v37 = vunpack.i.l.bf16 %v1704_v5  ;;  %1465 = vmatmul.mubr.msk.bf16.vlgmr.msra.gmra.mxu1 %vm504_vm9, %v2265_v9  ;;  %v1218_v33 = vpack.c.bf16 %v1081_v27, %v1035_v48  ;;  %v929_v7 = vsel %vm200_vm6, %v1651_v54, %v1661_v20  ;;  %v1681_v23 = vunpack.i.h.bf16 %v2239_v60 }
 0x353   :  { %1296 = vmatprep.subr.bf16.mxu0 %v1217_v36  ;;  %1336 = vmatpush1.bf16.msra.mxu1 %v1242_v14  ;;  %v1706_v47 = vunpack.i.h.bf16 %v1704_v5  ;;  %v930_v44 = vsel %vm200_vm6, %v1661_v20, %v1710_v25  ;;  %v1212_v54 = vpack.c.bf16 %v989_v39, %v2103_v50  ;;  %v1204_v60 = vpack.c.bf16 %v929_v7, %v883_v19 }
 0x354   :  { %1297 = vmatpush1.bf16.msra.mxu0 %v1216_v12  ;;  %1337 = vmatprep.subr.bf16.mxu1 %v1219_v22  ;;  %v884_v51 = vsel %vm153_vm5, %v1656_v61, %v1705_v37  ;;  %v791_v49 = vsel %vm59_vm7, %v1666_v3, %v1681_v23  ;;  %v931_v50 = vsel %vm200_vm6, %v1710_v25, %v1711_v55 }
 0x355   :  { %v830_v45 = vpop.permute.xlu1 %829  ;;  %1298 = vmatprep.subr.bf16.mxu0 %v1211_v31  ;;  %1361 = vmatprep.mubr.bf16.mxu1 %v1734_v13  ;;  %v1205_v40 = vpack.c.bf16 %v930_v44, %v884_v51  ;;  %v1715_v13 = vunpack.i.l.bf16 %v2279_v56  ;;  %v885_v57 = vsel %vm153_vm5, %v1705_v37, %v1706_v47  ;;  %v886_v8 = vsel %vm153_vm5, %v1706_v47, %v880_v32 }
 0x356   :  { %v838_v4 = vsel %vm106_vm8, %v1686_v2, %v830_v45  ;;  %v837_v59 = vsel %vm106_vm8, %v1671_v35, %v1686_v2  ;;  %v1206_v42 = vpack.c.bf16 %v931_v50, %v885_v57  ;;  %v794_v34 = vsel %vm59_vm7, %v1716_v26, %v788_v62 }
 0x357   :  { %1338 = vmatpush1.bf16.msra.mxu1 %v1218_v33  ;;  %v792_v53 = vsel %vm59_vm7, %v1681_v23, %v1715_v13  ;;  %v1198_v17 = vpack.c.bf16 %v837_v59, %v791_v49  ;;  %v793_v12 = vsel %vm59_vm7, %v1715_v13, %v1716_v26 }
 0x358   :  { %1299 = vmatpush1.bf16.msra.mxu0 %v1210_v38  ;;  %1339 = vmatprep.subr.bf16.mxu1 %v1213_v46  ;;  %v1199_v21 = vpack.c.bf16 %v838_v4, %v792_v53 }
 0x359   :  { %v926_v52 = vpop.permute.xlu1 %925  ;;  %1300 = vmatprep.subr.bf16.mxu0 %v1205_v40 }
 0x35a   :  { %v932_v10 = vsel %vm200_vm6, %v1711_v55, %v926_v52 }
 0x35b   :  { %v1207_v58 = vpack.c.bf16 %v932_v10, %v886_v8  ;;  %1340 = vmatpush1.bf16.msra.mxu1 %v1212_v54  ;;  %v1371_v10 = vld [vmem:[%s2383_s7] sm:$0xff] }
 0x35c   :  { %1301 = vmatpush1.bf16.msra.mxu0 %v1204_v60 }
 0x35d   :  { %v1719_v6 = vpop.permute.xlu1 %1718  ;;  %1302 = vmatprep.subr.bf16.mxu0 %v1199_v21  ;;  %1341 = vmatprep.subr.bf16.mxu1 %v1207_v58 }
 0x35e   :  { %v1721_v61 = vunpack.i.h.bf16 %v1719_v6  ;;  %v1720_v3 = vunpack.i.l.bf16 %v1719_v6 }
 0x35f   :  { %1342 = vmatpush1.bf16.msra.mxu1 %v1206_v42  ;;  %v1408_v42 = vld [vmem:[%s2376_s0 + $0x8] sm:$0xff] }
 0x360   :  { %v839_v14 = vsel %vm106_vm8, %v830_v45, %v1720_v3  ;;  %1303 = vmatpush1.bf16.msra.mxu0 %v1198_v17  ;;  %v840_v28 = vsel %vm106_vm8, %v1720_v3, %v1721_v61  ;;  %v1409_v61 = vld [vmem:[%s2376_s0 + $0x10] sm:$0xff]  ;;  %v1410_v3 = vld [vmem:[%s2376_s0 + $0x18] sm:$0xff] }
 0x361   :  { %v1200_v0 = vpack.c.bf16 %v839_v14, %v793_v12  ;;  %v1201_v35 = vpack.c.bf16 %v840_v28, %v794_v34  ;;  %v1411_v12 = vld [vmem:[%s2376_s0 + $0x20] sm:$0xff]  ;;  %v1412_v14 = vld [vmem:[%s2376_s0 + $0x28] sm:$0xff]  ;;  %v1413_v28 = vld [vmem:[%s2376_s0 + $0x30] sm:$0xff] }
 0x363   :  { %1467 = vmatmul.mubr.msk.bf16.vlgmr.msra.gmra.mxu0 %vm504_vm9, %v2265_v9  ;;  %1343 = vmatprep.subr.bf16.mxu1 %v1201_v35 }
 0x364   :  { %1344 = vmatpush1.bf16.msra.mxu1 %v1200_v0 }
 0x367   :  { %1469 = vmatmul.mubr.msk.bf16.vlgmr.msra.gmra.mxu1 %vm504_vm9, %v2265_v9 }
 0x412   :  { %v1281_v1 = vpop.f32.mrf.mxu1 }
 0x413   :  { %v1372_v5 = vmul.f32 %v1281_v1, %v2043_v24 }
 0x414   :  { %v1283_v63 = vpop.f32.mrf.mxu1 }
 0x415   :  { %v1373_v56 = vmul.f32 %v1283_v63, %v2045_v41  ;;  %v1386_v18 = vmul.f32 %v1372_v5, %v1281_v1 }
 0x416   :  { %v1285_v15 = vpop.f32.mrf.mxu1 }
 0x417   :  { %v1387_v36 = vmul.f32 %v1373_v56, %v1283_v63  ;;  %v1378_v25 = vadd.f32 %v1373_v56, %v1372_v5 }
 0x418   :  { %v1286_v16 = vpop.f32.mrf.mxu1 }
 0x419   :  { %v1392_v37 = vadd.f32 %v1387_v36, %v1386_v18 }
 0x423   :  { %v1322_v22 = vpop.f32.mrf.mxu0 }
 0x424   :  { %v1374_v20 = vmul.f32 %v1322_v22, %v2051_v29 }
 0x425   :  { %v1324_v48 = vpop.f32.mrf.mxu0 }
 0x426   :  { %v1379_v31 = vadd.f32 %v1378_v25, %v1374_v20  ;;  %v1388_v27 = vmul.f32 %v1374_v20, %v1322_v22  ;;  %v1375_v9 = vmul.f32 %v1324_v48, %v2053_v30 }
 0x427   :  { %v1326_v38 = vpop.f32.mrf.mxu0  ;;  %v1363_v51 = vpop.f32.mrf.mxu1 }
 0x428   :  { %v1393_v2 = vadd.f32 %v1392_v37, %v1388_v27  ;;  %v1389_v39 = vmul.f32 %v1375_v9, %v1324_v48  ;;  %v1376_v41 = vmul.f32 %v1363_v51, %v2059_v43  ;;  %v1380_v33 = vadd.f32 %v1379_v31, %v1375_v9 }
 0x429   :  { %v1327_v24 = vpop.f32.mrf.mxu0  ;;  %v1365_v45 = vpop.f32.mrf.mxu1 }
 0x42a   :  { %v1390_v46 = vmul.f32 %v1376_v41, %v1363_v51  ;;  %v1377_v7 = vmul.f32 %v1365_v45, %v2061_v11  ;;  %v1381_v23 = vadd.f32 %v1380_v33, %v1376_v41  ;;  %v1394_v29 = vadd.f32 %v1393_v2, %v1389_v39  ;;  %v1370_v11 = vld [vmem:[%s2382_s6] sm:$0xff] }
 0x42b   :  { %v1367_v47 = vpop.f32.mrf.mxu1 }
 0x42c   :  { %v1382_v44 = vadd.f32 %v1381_v23, %v1377_v7  ;;  %v1391_v32 = vmul.f32 %v1377_v7, %v1365_v45  ;;  %v1395_v40 = vadd.f32 %v1394_v29, %v1390_v46 }
 0x42d   :  { %v1368_v19 = vpop.f32.mrf.mxu1 }
 0x42e   :  { %1383 = vadd.xlane.f32.xlu0 %v1382_v44  ;;  %v1396_v30 = vadd.f32 %v1395_v40, %v1391_v32 }
 0x430   :  { %1397 = vadd.xlane.f32.xlu1 %v1396_v30 }
 0x4b7   :  { %v1384_v55 = vpop.xlane.xlu0 %1383 }
 0x4b8   :  { %v1385_v13 = vmul.f32 0.001953125, %v1384_v55 }
 0x4b9   :  { %v1398_v4 = vpop.xlane.xlu1 %1397 }
 0x4ba   :  { %v1400_v43 = vmul.f32 %v1385_v13, %v1385_v13  ;;  %v1399_v54 = vmul.f32 0.001953125, %v1398_v4 }
 0x4bc   :  { %v1401_v60 = vsub.f32 %v1399_v54, %v1400_v43 }
 0x4be   :  { %v1402_v52 = vmax.f32 %v1401_v60, 0.0 }
 0x4c0   :  { %v1403_v57 = vadd.f32 1e-05, %v1402_v52 }
 0x4c2   :  { %1724 = vrsqrt.f32 %v1403_v57 }
 0x4cf   :  { %v1725_v53 = vpop.eup %1724 }
 0x4d0   :  { %v1405_v8 = vmul.f32 %v1725_v53, %v1370_v11 }
 0x4d2   :  { %1416 = vperm.xlu0 %1600, %v1405_v8   ;;  %v1406_v49 = vmul.f32 %v1405_v8, %v1385_v13 }
 0x4d4   :  { %v1407_v21 = vsub.f32 %v1371_v10, %v1406_v49 }
 0x4d6   :  { %1427 = vperm.xlu1 %1601, %v1407_v21  }
 0x54d   :  { %v1417_v58 = vpop.permute.xlu0 %1416 }
 0x54e   :  { %v1419_v50 = vmul.f32 %v1417_v58, %v1281_v1  ;;  %v1420_v26 = vmul.f32 %v1417_v58, %v1283_v63  ;;  %v1421_v59 = vmul.f32 %v1417_v58, %v1322_v22  ;;  %v1422_v62 = vmul.f32 %v1417_v58, %v1324_v48 }
 0x54f   :  { %v1423_v6 = vmul.f32 %v1417_v58, %v1363_v51  ;;  %v1424_v17 = vmul.f32 %v1417_v58, %v1365_v45 }
 0x551   :  { %v1428_v34 = vpop.permute.xlu1 %1427 }
 0x552   :  { %v1430_v0 = vadd.f32 %v1428_v34, %v1419_v50  ;;  %v1431_v35 = vadd.f32 %v1428_v34, %v1420_v26  ;;  %v1432_v1 = vadd.f32 %v1428_v34, %v1421_v59  ;;  %v1433_v63 = vadd.f32 %v1428_v34, %v1422_v62 }
 0x553   :  { %v1434_v15 = vadd.f32 %v1428_v34, %v1423_v6  ;;  %v1435_v16 = vadd.f32 %v1428_v34, %v1424_v17 }
 0x554   :  { %v1436_v56 = vadd.f32 %v1430_v0, %v1408_v42  ;;  %v1437_v5 = vadd.f32 %v1431_v35, %v1409_v61  ;;  %v1438_v36 = vadd.f32 %v1432_v1, %v1410_v3  ;;  %v1439_v22 = vadd.f32 %v1433_v63, %v1411_v12 }
 0x555   :  { %v1440_v18 = vadd.f32 %v1434_v15, %v1412_v14  ;;  %v1441_v25 = vadd.f32 %v1435_v16, %v1413_v28 }
 0x556   :  { %v1442_v20 = vmax.f32 %v1436_v56, 0.0  ;;  %v1443_v48 = vmax.f32 %v1437_v5, 0.0  ;;  %v1444_v37 = vmax.f32 %v1438_v36, 0.0  ;;  %v1445_v31 = vmax.f32 %v1439_v22, 0.0 }
 0x557   :  { %v1446_v27 = vmax.f32 %v1440_v18, 0.0  ;;  %v1447_v9 = vmax.f32 %v1441_v25, 0.0 }
 0x558   :  { %1448 = vst [vmem:[%s2384_s8] sm:$0xff] %v1442_v20  ;;  %1449 = vst [vmem:[%s2384_s8 + $0x8] sm:$0xff] %v1443_v48 }
 0x559   :  { %1450 = vst [vmem:[%s2384_s8 + $0x10] sm:$0xff] %v1444_v37  ;;  %1451 = vst [vmem:[%s2384_s8 + $0x18] sm:$0xff] %v1445_v31 }
 0x55a   :  { %1452 = vst [vmem:[%s2384_s8 + $0x20] sm:$0xff] %v1446_v27  ;;  %1453 = vst [vmem:[%s2384_s8 + $0x28] sm:$0xff] %v1447_v9 }

</bundles_post_ra>
